<compile_context>
chip_gen: v7x
topology: tpu7x:2x2x1
jax: 0.10.0
libtpu: 0.0.40
codegen_flags: <defaults>
</compile_context>

<pallas_src>
import functools

import jax
import jax.numpy as jnp
from jax import lax
from jax.experimental import pallas as pl
from jax.experimental.pallas import tpu as pltpu


LANES = 128


def _round_up(n, m):
    return ((n + m - 1) // m) * m


def _largest_divisor_leq(n, cap):
    for d in range(min(cap, n), 0, -1):
        if n % d == 0:
            return d
    return 1


@functools.lru_cache(maxsize=1)
def _chip_info():
    """-> (is_v5, vmem_limit_bytes), derived from the attached TPU generation."""
    kind = ""
    try:
        kind = jax.devices()[0].device_kind.lower()
    except Exception:
        pass
    is_v5 = "v5" in kind
    vmem_cap = None
    try:
        vmem_cap = int(pltpu.get_tpu_info().vmem_capacity_bytes)
    except Exception:
        vmem_cap = None
    if vmem_cap is None:
        vmem_cap = 64 * 1024 * 1024 if "v7" in kind else 128 * 1024 * 1024
    # With row tiling ~24-32 MiB is plenty; leave headroom on 64 MiB (v7x) parts.
    vmem_limit = 24 * 1024 * 1024 if vmem_cap <= 64 * 1024 * 1024 else 32 * 1024 * 1024
    return is_v5, vmem_limit


# ---------------------------------------------------------------------------
# Kernel 1: spectral-norm power iteration for ALL convs of the block in one
# launch  ->  (1/sigma_i, updated u_i) per conv.
# ---------------------------------------------------------------------------
def _sn_power_multi_kernel(*refs, n_layers, num_itrs, eps):
    w_refs = refs[0:2 * n_layers:2]
    u_refs = refs[1:2 * n_layers:2]
    inv_refs = refs[2 * n_layers:3 * n_layers]
    uout_refs = refs[3 * n_layers:4 * n_layers]
    for li in range(n_layers):
        w = w_refs[li][...]                       # (O, K) f32 == weight.view(O, -1)
        u = u_refs[li][...]                       # (1, O) f32
        wv = None
        for _ in range(num_itrs):
            # v = normalize(u @ W)                (1, K)
            v = jnp.dot(u, w, preferred_element_type=jnp.float32)
            v = v / jnp.maximum(jnp.sqrt(jnp.sum(v * v, keepdims=True)), eps)
            # u = normalize(v @ W^T)              (1, O)
            wv = lax.dot_general(v, w, (((1,), (1,)), ((), ())),
                                 preferred_element_type=jnp.float32)
            u = wv / jnp.maximum(jnp.sqrt(jnp.sum(wv * wv, keepdims=True)), eps)
        sigma = jnp.sum(wv * u, keepdims=True)    # (1, 1) f32
        inv_refs[li][...] = 1.0 / sigma
        uout_refs[li][...] = u


def sn_power_iteration_multi(weights, us, *, num_itrs=1, eps=1e-12, vmem_limit=None):
    """weights: list of (O, Ci, kh, kw); us: list of (1, O).
    Returns ([inv_sigma_i (1,1)], [u_new_i (1,O)])."""
    assert num_itrs >= 1 and len(weights) == len(us)
    n = len(weights)
    w2ds = [w.reshape(w.shape[0], -1).astype(jnp.float32) for w in weights]
    u2ds = [u.reshape(1, w.shape[0]).astype(jnp.float32) for w, u in zip(weights, us)]
    out_shape = tuple(
        [jax.ShapeDtypeStruct((1, 1), jnp.float32) for _ in range(n)]
        + [jax.ShapeDtypeStruct((1, w.shape[0]), jnp.float32) for w in weights])
    vmem_spec = pl.BlockSpec(memory_space=pltpu.MemorySpace.VMEM)
    # TODO(synk): for very large layers (O~1024, 3x3 -> ~38 MiB f32 weight view)
    # the K dimension would need tiling (or bf16 matmul inputs); fine at block sizes here.
    outs = pl.pallas_call(
        functools.partial(_sn_power_multi_kernel, n_layers=n,
                          num_itrs=num_itrs, eps=eps),
        out_shape=out_shape,
        in_specs=[vmem_spec] * (2 * n),
        out_specs=tuple([vmem_spec] * (2 * n)),
        compiler_params=pltpu.CompilerParams(vmem_limit_bytes=vmem_limit),
    )(*[a for pair in zip(w2ds, u2ds) for a in pair])
    return list(outs[:n]), list(outs[n:])


# ---------------------------------------------------------------------------
# Kernel 2: implicit-GEMM spectrally-normalized conv (NHWC, stride 1) with
# row/cout tiling, fused 1/sigma + bias (+ optional residual) epilogue.
# ---------------------------------------------------------------------------
def _snconv_kernel(*refs, kh, kw, th, thk, wp, wo, relu_input, has_residual):
    if has_residual:
        inv_ref, x_ref, w_ref, b_ref, res_ref, o_ref = refs
    else:
        inv_ref, x_ref, w_ref, b_ref, o_ref = refs
        res_ref = None

    cx = x_ref.shape[3]
    tn = o_ref.shape[3]
    r = pl.program_id(1)       # output-row tile
    jc = pl.program_id(2)      # cout tile
    row0 = pl.multiple_of(r * th, th)

    # Row slab (output rows [r*th, r*th+th) plus the kernel halo).  ReLU is
    # applied once here (hoisted out of the tap loop) and the slab is
    # flattened full-width so every tap's operand is a contiguous row window
    # (no per-tap (ho, wo) gather/relayout copy).
    slab = x_ref[0, pl.ds(row0, thk), :, :]              # (thk, wp, cx) bf16
    if relu_input:
        slab = jnp.maximum(slab, 0)
    flat = slab.reshape(thk * wp, cx)

    acc = jnp.zeros((th * wp, tn), jnp.float32)
    for t in range(kh * kw):
        i, j = divmod(t, kw)
        start = i * wp + j
        acc = acc + jnp.dot(flat[start:start + th * wp, :], w_ref[jc, t],
                            preferred_element_type=jnp.float32)

    out = acc * inv_ref[0, 0] + b_ref[jc]                # conv(x, W)/sigma + b
    out = out.reshape(th, wp, tn)[:, :wo, :]             # drop halo columns
    if has_residual:
        out = out + res_ref[0].astype(jnp.float32)       # fused shortcut add
    o_ref[...] = out.reshape(1, th, wo, tn).astype(o_ref.dtype)


def _im2col_nhwc(x, kh, kw, pad):
    """Host-side patch relayout for small-Cin convs (folds kh*kw*Cin into K)."""
    n, h, w, c = x.shape
    xp = jnp.pad(x, ((0, 0), (pad, pad), (pad, pad), (0, 0))) if pad else x
    ho = h + 2 * pad - kh + 1
    wo = w + 2 * pad - kw + 1
    cols = [xp[:, i:i + ho, j:j + wo, :] for i in range(kh) for j in range(kw)]
    return jnp.concatenate(cols, axis=-1)                # (n, ho, wo, kh*kw*c)


def sn_conv2d_nhwc(x_nhwc, w_oihw, bias, inv_sigma, *, padding, relu_input=False,
                   residual=None, out_dtype=jnp.bfloat16, pack_taps=False):
    """Spectrally-normalized stride-1 conv on an NHWC activation.

    x may carry zero-padded channels (Cx >= Ci).  The output has
    round_up(Cout, 128) channels (zero padded) so stores are lane-dense.
    `residual` (shape (N, Ho, Wo, Op)) is added inside the epilogue.
    Returns y of shape (N, Ho, Wo, round_up(Cout, 128)).
    """
    O, Ci, kh, kw = w_oihw.shape
    w_f32 = jnp.transpose(w_oihw.astype(jnp.float32), (2, 3, 1, 0))   # (kh,kw,Ci,O)
    if pack_taps and kh * kw > 1:
        # Fold the taps into the contraction dim (one MXU pass instead of kh*kw).
        x_nhwc = _im2col_nhwc(x_nhwc, kh, kw, padding)
        w_k = w_f32.reshape(kh * kw * Ci, O)[None]        # (1, kh*kw*Ci, O)
        kh_eff = kw_eff = 1
        pad_eff = 0
    else:
        w_k = w_f32.reshape(kh * kw, Ci, O)               # (KT, Ci, O)
        kh_eff, kw_eff = kh, kw
        pad_eff = padding

    N, H, W, cx_in = x_nhwc.shape
    KT, ci_eff, _ = w_k.shape
    assert cx_in >= ci_eff, (cx_in, ci_eff)

    is_v5, vmem_limit = _chip_info()

    Cx = _round_up(cx_in, 8)                  # sublane-friendly contraction dim
    Op = _round_up(O, LANES)                  # lane-dense output channels
    tn = 256 if (Op % 256 == 0 and not is_v5) else LANES
    JT = Op // tn

    # Weight -> (JT, KT, Cx, tn): the whole tensor stays VMEM-resident
    # (constant index_map); the kernel picks its cout tile via the leading dim.
    w_full = jnp.pad(w_k, ((0, 0), (0, Cx - ci_eff), (0, Op - O)))
    w_tiled = (w_full.reshape(KT, Cx, JT, tn).transpose(2, 0, 1, 3)
               .astype(jnp.bfloat16))
    bias_p = jnp.pad(bias.astype(jnp.float32), (0, Op - O)).reshape(JT, 1, tn)

    p = pad_eff
    Wp_raw = W + 2 * p
    Wp = _round_up(Wp_raw, 8)                 # full-width rows, layout friendly
    Ho = H + 2 * p - kh_eff + 1
    Wo = Wp_raw - kw_eff + 1
    extra_rows = 1 if kw_eff > 1 else 0       # keeps the last tap's row window in bounds
    Hp_arr = H + 2 * p + extra_rows

    # TODO(synk): the spatial/channel pad below is still a host-side XLA op
    # between pallas_calls; fusing it into the producer's epilogue (halo write)
    # would save one HBM round-trip of the intermediate activation.
    pads = ((0, 0), (p, p + extra_rows), (p, Wp - W - p), (0, Cx - cx_in))
    x_p = jnp.pad(x_nhwc, pads) if any(lo or hi for lo, hi in pads) else x_nhwc
    x_p = x_p.astype(jnp.bfloat16)

    TH = _largest_divisor_leq(Ho, 8)          # bounds the f32 accumulator
    RT = Ho // TH
    THK = TH + kh_eff - 1 + extra_rows
    grid = (N, RT, JT)

    has_res = residual is not None
    if has_res:
        assert residual.shape == (N, Ho, Wo, Op), (residual.shape, (N, Ho, Wo, Op))

    in_specs = [
        pl.BlockSpec(memory_space=pltpu.MemorySpace.SMEM),                 # 1/sigma
        pl.BlockSpec((1, Hp_arr, Wp, Cx), lambda n, r, j: (n, 0, 0, 0)),   # image (resident per n)
        pl.BlockSpec((JT, KT, Cx, tn), lambda n, r, j: (0, 0, 0, 0)),      # weights (resident)
        pl.BlockSpec((JT, 1, tn), lambda n, r, j: (0, 0, 0)),              # bias    (resident)
    ]
    inputs = [inv_sigma, x_p, w_tiled, bias_p]
    if has_res:
        in_specs.append(pl.BlockSpec((1, TH, Wo, tn), lambda n, r, j: (n, r, 0, j)))
        inputs.append(residual)

    out_itemsize = jnp.dtype(out_dtype).itemsize
    cost = pl.CostEstimate(
        flops=2 * N * RT * JT * KT * TH * Wp * Cx * tn,
        transcendentals=0,
        bytes_accessed=int(x_p.size * 2 + w_tiled.size * 2 + bias_p.size * 4 + 4
                           + (residual.size * residual.dtype.itemsize if has_res else 0)
                           + N * Ho * Wo * Op * out_itemsize),
    )

    return pl.pallas_call(
        functools.partial(_snconv_kernel, kh=kh_eff, kw=kw_eff, th=TH, thk=THK,
                          wp=Wp, wo=Wo, relu_input=relu_input,
                          has_residual=has_res),
        out_shape=jax.ShapeDtypeStruct((N, Ho, Wo, Op), out_dtype),
        grid=grid,
        in_specs=in_specs,
        out_specs=pl.BlockSpec((1, TH, Wo, tn), lambda n, r, j: (n, r, 0, j)),
        compiler_params=pltpu.CompilerParams(
            dimension_semantics=("parallel", "parallel", "parallel"),
            vmem_limit_bytes=vmem_limit),
        cost_estimate=cost,
    )(*inputs)


# ---------------------------------------------------------------------------
# BigGDBlock forward
# ---------------------------------------------------------------------------
def avg_pool2x2_nhwc(x):
    """Optional `downsample` callable (nn.AvgPool2d(2) equivalent), NHWC."""
    # TODO(synk): plain XLA reshape-mean, not a Pallas kernel (bandwidth-trivial).
    n, h, w, c = x.shape
    return x.reshape(n, h // 2, 2, w // 2, 2, c).mean(axis=(2, 4)).astype(x.dtype)


def big_gd_block_forward(x_nchw, params, *, wide=True, preactivation=False,
                         downsample=None, num_itrs=1):
    """BigGDBlock forward.  params: dict conv1/conv2/conv_sc ->
    (weight (O,Ci,kh,kw), bias (O,), u (1,O)).  x_nchw is PyTorch-layout NCHW."""
    del wide  # hidden_channels is implied by params["conv1"]'s output channels
    N, Cin, H, W = x_nchw.shape
    w1, b1, u1 = params["conv1"]
    w2, b2, u2 = params["conv2"]
    Cout = w2.shape[0]
    learnable_sc = (Cin != Cout) or (downsample is not None)
    _, vmem_limit = _chip_info()

    # --- one launch computes 1/sigma for every SN conv of the block ----------
    ws, us = [w1, w2], [u1, u2]
    if learnable_sc:
        wsc, bsc, usc = params["conv_sc"]
        ws.append(wsc)
        us.append(usc)
    invs, _u_new = sn_power_iteration_multi(ws, us, num_itrs=num_itrs,
                                            vmem_limit=vmem_limit)
    inv1, inv2 = invs[0], invs[1]
    inv_sc = invs[2] if learnable_sc else None
    # TODO(synk): the updated power-iteration `u` buffers (training-mode state)
    # are computed but dropped, matching an eval-mode forward.

    # One NCHW -> NHWC relayout + bf16 cast; every kernel runs channel-last.
    x_nhwc = jnp.transpose(x_nchw, (0, 2, 3, 1)).astype(jnp.bfloat16)
    Op_out = _round_up(Cout, LANES)

    def pad_channels(t):
        return jnp.pad(t, ((0, 0), (0, 0), (0, 0), (0, Op_out - t.shape[-1])))

    # --- conv1: relu fused on its input; taps packed into K for small Cin ----
    pack1 = w1.shape[1] * w1.shape[2] * w1.shape[3] <= 512
    h = sn_conv2d_nhwc(x_nhwc, w1, b1, inv1, padding=1,
                       relu_input=preactivation, out_dtype=jnp.bfloat16,
                       pack_taps=pack1)

    # --- conv2 (+ shortcut) ---------------------------------------------------
    # TODO(synk): only ReLU is fused as the inter-conv `activation`; the module
    # accepts an arbitrary nn.Module.
    if downsample is None:
        # Shortcut first, then fuse the residual add into conv2's epilogue.
        if learnable_sc:
            sc = sn_conv2d_nhwc(x_nhwc, wsc, bsc, inv_sc, padding=0,
                                relu_input=False, out_dtype=jnp.float32)
        else:
            sc = pad_channels(x_nhwc)
        y_nhwc = sn_conv2d_nhwc(h, w2, b2, inv2, padding=1, relu_input=True,
                                residual=sc, out_dtype=jnp.float32)
    else:
        # TODO(synk): with a downsample in play the residual add stays in XLA.
        h = sn_conv2d_nhwc(h, w2, b2, inv2, padding=1, relu_input=True,
                           out_dtype=jnp.float32)
        h = downsample(h)
        if preactivation:
            sc = (sn_conv2d_nhwc(x_nhwc, wsc, bsc, inv_sc, padding=0,
                                 relu_input=False, out_dtype=jnp.float32)
                  if learnable_sc else pad_channels(x_nhwc))
            sc = downsample(sc)
        else:
            sc = downsample(x_nhwc)
            sc = (sn_conv2d_nhwc(sc, wsc, bsc, inv_sc, padding=0,
                                 relu_input=False, out_dtype=jnp.float32)
                  if learnable_sc else pad_channels(sc))
        y_nhwc = h + sc.astype(jnp.float32)

    # strip channel padding, back to NCHW f32
    y = y_nhwc[..., :Cout].astype(jnp.float32)
    return jnp.transpose(y, (0, 3, 1, 2))


if __name__ == "__main__":
    key = jax.random.PRNGKey(0)
    ks = jax.random.split(key, 10)

    # BigGDBlock(in_channels=4, out_channels=8, wide=True) -> hidden = 8
    N, Cin, H, W = 2, 4, 16, 16
    Cout = 8
    hidden = Cout  # wide=True

    x = jax.random.normal(ks[0], (N, Cin, H, W), dtype=jnp.float32)

    def conv_params(subkeys, o, ci, k):
        w = jax.random.normal(subkeys[0], (o, ci, k, k), dtype=jnp.float32) * 0.1
        b = jax.random.normal(subkeys[1], (o,), dtype=jnp.float32) * 0.1
        u = jax.random.normal(subkeys[2], (1, o), dtype=jnp.float32)  # SN buffer randn(1, O)
        return w, b, u

    params = {
        "conv1": conv_params(ks[1:4], hidden, Cin, 3),    # 3x3, pad 1
        "conv2": conv_params(ks[4:7], Cout, hidden, 3),   # 3x3, pad 1
        "conv_sc": conv_params(ks[7:10], Cout, Cin, 1),   # 1x1, pad 0
    }

    y = big_gd_block_forward(x, params, wide=True, preactivation=False,
                             downsample=None, num_itrs=1)
    jax.block_until_ready(y)
    assert y.shape == (N, Cout, H, W), y.shape
    print("KERNEL_OK")
</pallas_src>

<mosaic_0001>
module attributes {stable_mosaic.version = 11 : i64} {
  func.func @_sn_power_multi_kernel(%arg0: memref<8x36xf32, #tpu.memory_space<vmem>>, %arg1: memref<1x8xf32, #tpu.memory_space<vmem>>, %arg2: memref<8x72xf32, #tpu.memory_space<vmem>>, %arg3: memref<1x8xf32, #tpu.memory_space<vmem>>, %arg4: memref<8x4xf32, #tpu.memory_space<vmem>>, %arg5: memref<1x8xf32, #tpu.memory_space<vmem>>, %arg6: memref<1x1xf32, #tpu.memory_space<vmem>>, %arg7: memref<1x1xf32, #tpu.memory_space<vmem>>, %arg8: memref<1x1xf32, #tpu.memory_space<vmem>>, %arg9: memref<1x8xf32, #tpu.memory_space<vmem>>, %arg10: memref<1x8xf32, #tpu.memory_space<vmem>>, %arg11: memref<1x8xf32, #tpu.memory_space<vmem>>) attributes {dimension_semantics = [], scalar_prefetch = 0 : i64, scratch_operands = 0 : i64, tpu.core_type = #tpu.core_type<tc>} {
    %c0 = arith.constant 0 : index
    %c0_0 = arith.constant 0 : index
    %0 = vector.load %arg0[%c0, %c0_0] : memref<8x36xf32, #tpu.memory_space<vmem>>, vector<8x36xf32>
    %c0_1 = arith.constant 0 : index
    %c0_2 = arith.constant 0 : index
    %1 = vector.load %arg1[%c0_1, %c0_2] : memref<1x8xf32, #tpu.memory_space<vmem>>, vector<1x8xf32>
    %cst = arith.constant dense<0.000000e+00> : vector<1x36xf32>
    %2 = tpu.matmul %1, %0, %cst {dimension_numbers = #tpu.dot_dimension_numbers<[1], [0], [0], [1], [0, 0, 1, 1], [], []>} : vector<1x8xf32>, vector<8x36xf32>, vector<1x36xf32> -> vector<1x36xf32>
    %3 = arith.mulf %2, %2 : vector<1x36xf32>
    %4 = vector.shape_cast %3 : vector<1x36xf32> to vector<1x1x36xf32>
    %cst_3 = arith.constant dense<0.000000e+00> : vector<1xf32>
    %5 = vector.multi_reduction <add>, %4, %cst_3 [1, 2] : vector<1x1x36xf32> to vector<1xf32>
    %6 = vector.shape_cast %5 : vector<1xf32> to vector<1x1x1xf32>
    %7 = vector.extract %6[0, 0, 0] : f32 from vector<1x1x1xf32>
    %8 = vector.broadcast %7 : f32 to vector<1x1xf32>
    %9 = math.sqrt %8 : vector<1x1xf32>
    %cst_4 = arith.constant 9.99999996E-13 : f32
    %10 = vector.broadcast %cst_4 : f32 to vector<1x1xf32>
    %11 = arith.maximumf %9, %10 : vector<1x1xf32>
    %12 = vector.broadcast %11 : vector<1x1xf32> to vector<1x36xf32>
    %13 = arith.divf %2, %12 : vector<1x36xf32>
    %cst_5 = arith.constant dense<0.000000e+00> : vector<1x8xf32>
    %14 = tpu.matmul %13, %0, %cst_5 {dimension_numbers = #tpu.dot_dimension_numbers<[1], [1], [0], [0], [0, 0, 1, 0], [], []>} : vector<1x36xf32>, vector<8x36xf32>, vector<1x8xf32> -> vector<1x8xf32>
    %15 = arith.mulf %14, %14 : vector<1x8xf32>
    %16 = vector.shape_cast %15 : vector<1x8xf32> to vector<1x1x8xf32>
    %cst_6 = arith.constant dense<0.000000e+00> : vector<1xf32>
    %17 = vector.multi_reduction <add>, %16, %cst_6 [1, 2] : vector<1x1x8xf32> to vector<1xf32>
    %18 = vector.shape_cast %17 : vector<1xf32> to vector<1x1x1xf32>
    %19 = vector.extract %18[0, 0, 0] : f32 from vector<1x1x1xf32>
    %20 = vector.broadcast %19 : f32 to vector<1x1xf32>
    %21 = math.sqrt %20 : vector<1x1xf32>
    %cst_7 = arith.constant 9.99999996E-13 : f32
    %22 = vector.broadcast %cst_7 : f32 to vector<1x1xf32>
    %23 = arith.maximumf %21, %22 : vector<1x1xf32>
    %24 = vector.broadcast %23 : vector<1x1xf32> to vector<1x8xf32>
    %25 = arith.divf %14, %24 : vector<1x8xf32>
    %26 = arith.mulf %14, %25 : vector<1x8xf32>
    %27 = vector.shape_cast %26 : vector<1x8xf32> to vector<1x1x8xf32>
    %cst_8 = arith.constant dense<0.000000e+00> : vector<1xf32>
    %28 = vector.multi_reduction <add>, %27, %cst_8 [1, 2] : vector<1x1x8xf32> to vector<1xf32>
    %29 = vector.shape_cast %28 : vector<1xf32> to vector<1x1x1xf32>
    %30 = vector.extract %29[0, 0, 0] : f32 from vector<1x1x1xf32>
    %31 = vector.broadcast %30 : f32 to vector<1x1xf32>
    %cst_9 = arith.constant 1.000000e+00 : f32
    %32 = vector.broadcast %cst_9 : f32 to vector<1x1xf32>
    %33 = arith.divf %32, %31 : vector<1x1xf32>
    %c0_10 = arith.constant 0 : index
    %c0_11 = arith.constant 0 : index
    %34 = vector.load %arg6[%c0_10, %c0_11] : memref<1x1xf32, #tpu.memory_space<vmem>>, vector<1x1xf32>
    tpu.vector_store %arg6[%c0_10, %c0_11], %33 {strides = array<i32>} : memref<1x1xf32, #tpu.memory_space<vmem>>, vector<1x1xf32>,
    %c0_12 = arith.constant 0 : index
    %c0_13 = arith.constant 0 : index
    %35 = vector.load %arg9[%c0_12, %c0_13] : memref<1x8xf32, #tpu.memory_space<vmem>>, vector<1x8xf32>
    tpu.vector_store %arg9[%c0_12, %c0_13], %25 {strides = array<i32>} : memref<1x8xf32, #tpu.memory_space<vmem>>, vector<1x8xf32>,
    %c0_14 = arith.constant 0 : index
    %c0_15 = arith.constant 0 : index
    %36 = vector.load %arg2[%c0_14, %c0_15] : memref<8x72xf32, #tpu.memory_space<vmem>>, vector<8x72xf32>
    %c0_16 = arith.constant 0 : index
    %c0_17 = arith.constant 0 : index
    %37 = vector.load %arg3[%c0_16, %c0_17] : memref<1x8xf32, #tpu.memory_space<vmem>>, vector<1x8xf32>
    %cst_18 = arith.constant dense<0.000000e+00> : vector<1x72xf32>
    %38 = tpu.matmul %37, %36, %cst_18 {dimension_numbers = #tpu.dot_dimension_numbers<[1], [0], [0], [1], [0, 0, 1, 1], [], []>} : vector<1x8xf32>, vector<8x72xf32>, vector<1x72xf32> -> vector<1x72xf32>
    %39 = arith.mulf %38, %38 : vector<1x72xf32>
    %40 = vector.shape_cast %39 : vector<1x72xf32> to vector<1x1x72xf32>
    %cst_19 = arith.constant dense<0.000000e+00> : vector<1xf32>
    %41 = vector.multi_reduction <add>, %40, %cst_19 [1, 2] : vector<1x1x72xf32> to vector<1xf32>
    %42 = vector.shape_cast %41 : vector<1xf32> to vector<1x1x1xf32>
    %43 = vector.extract %42[0, 0, 0] : f32 from vector<1x1x1xf32>
    %44 = vector.broadcast %43 : f32 to vector<1x1xf32>
    %45 = math.sqrt %44 : vector<1x1xf32>
    %cst_20 = arith.constant 9.99999996E-13 : f32
    %46 = vector.broadcast %cst_20 : f32 to vector<1x1xf32>
    %47 = arith.maximumf %45, %46 : vector<1x1xf32>
    %48 = vector.broadcast %47 : vector<1x1xf32> to vector<1x72xf32>
    %49 = arith.divf %38, %48 : vector<1x72xf32>
    %cst_21 = arith.constant dense<0.000000e+00> : vector<1x8xf32>
    %50 = tpu.matmul %49, %36, %cst_21 {dimension_numbers = #tpu.dot_dimension_numbers<[1], [1], [0], [0], [0, 0, 1, 0], [], []>} : vector<1x72xf32>, vector<8x72xf32>, vector<1x8xf32> -> vector<1x8xf32>
    %51 = arith.mulf %50, %50 : vector<1x8xf32>
    %52 = vector.shape_cast %51 : vector<1x8xf32> to vector<1x1x8xf32>
    %cst_22 = arith.constant dense<0.000000e+00> : vector<1xf32>
    %53 = vector.multi_reduction <add>, %52, %cst_22 [1, 2] : vector<1x1x8xf32> to vector<1xf32>
    %54 = vector.shape_cast %53 : vector<1xf32> to vector<1x1x1xf32>
    %55 = vector.extract %54[0, 0, 0] : f32 from vector<1x1x1xf32>
    %56 = vector.broadcast %55 : f32 to vector<1x1xf32>
    %57 = math.sqrt %56 : vector<1x1xf32>
    %cst_23 = arith.constant 9.99999996E-13 : f32
    %58 = vector.broadcast %cst_23 : f32 to vector<1x1xf32>
    %59 = arith.maximumf %57, %58 : vector<1x1xf32>
    %60 = vector.broadcast %59 : vector<1x1xf32> to vector<1x8xf32>
    %61 = arith.divf %50, %60 : vector<1x8xf32>
    %62 = arith.mulf %50, %61 : vector<1x8xf32>
    %63 = vector.shape_cast %62 : vector<1x8xf32> to vector<1x1x8xf32>
    %cst_24 = arith.constant dense<0.000000e+00> : vector<1xf32>
    %64 = vector.multi_reduction <add>, %63, %cst_24 [1, 2] : vector<1x1x8xf32> to vector<1xf32>
    %65 = vector.shape_cast %64 : vector<1xf32> to vector<1x1x1xf32>
    %66 = vector.extract %65[0, 0, 0] : f32 from vector<1x1x1xf32>
    %67 = vector.broadcast %66 : f32 to vector<1x1xf32>
    %cst_25 = arith.constant 1.000000e+00 : f32
    %68 = vector.broadcast %cst_25 : f32 to vector<1x1xf32>
    %69 = arith.divf %68, %67 : vector<1x1xf32>
    %c0_26 = arith.constant 0 : index
    %c0_27 = arith.constant 0 : index
    %70 = vector.load %arg7[%c0_26, %c0_27] : memref<1x1xf32, #tpu.memory_space<vmem>>, vector<1x1xf32>
    tpu.vector_store %arg7[%c0_26, %c0_27], %69 {strides = array<i32>} : memref<1x1xf32, #tpu.memory_space<vmem>>, vector<1x1xf32>,
    %c0_28 = arith.constant 0 : index
    %c0_29 = arith.constant 0 : index
    %71 = vector.load %arg10[%c0_28, %c0_29] : memref<1x8xf32, #tpu.memory_space<vmem>>, vector<1x8xf32>
    tpu.vector_store %arg10[%c0_28, %c0_29], %61 {strides = array<i32>} : memref<1x8xf32, #tpu.memory_space<vmem>>, vector<1x8xf32>,
    %c0_30 = arith.constant 0 : index
    %c0_31 = arith.constant 0 : index
    %72 = vector.load %arg4[%c0_30, %c0_31] : memref<8x4xf32, #tpu.memory_space<vmem>>, vector<8x4xf32>
    %c0_32 = arith.constant 0 : index
    %c0_33 = arith.constant 0 : index
    %73 = vector.load %arg5[%c0_32, %c0_33] : memref<1x8xf32, #tpu.memory_space<vmem>>, vector<1x8xf32>
    %cst_34 = arith.constant dense<0.000000e+00> : vector<1x4xf32>
    %74 = tpu.matmul %73, %72, %cst_34 {dimension_numbers = #tpu.dot_dimension_numbers<[1], [0], [0], [1], [0, 0, 1, 1], [], []>} : vector<1x8xf32>, vector<8x4xf32>, vector<1x4xf32> -> vector<1x4xf32>
    %75 = arith.mulf %74, %74 : vector<1x4xf32>
    %76 = vector.shape_cast %75 : vector<1x4xf32> to vector<1x1x4xf32>
    %cst_35 = arith.constant dense<0.000000e+00> : vector<1xf32>
    %77 = vector.multi_reduction <add>, %76, %cst_35 [1, 2] : vector<1x1x4xf32> to vector<1xf32>
    %78 = vector.shape_cast %77 : vector<1xf32> to vector<1x1x1xf32>
    %79 = vector.extract %78[0, 0, 0] : f32 from vector<1x1x1xf32>
    %80 = vector.broadcast %79 : f32 to vector<1x1xf32>
    %81 = math.sqrt %80 : vector<1x1xf32>
    %cst_36 = arith.constant 9.99999996E-13 : f32
    %82 = vector.broadcast %cst_36 : f32 to vector<1x1xf32>
    %83 = arith.maximumf %81, %82 : vector<1x1xf32>
    %84 = vector.broadcast %83 : vector<1x1xf32> to vector<1x4xf32>
    %85 = arith.divf %74, %84 : vector<1x4xf32>
    %cst_37 = arith.constant dense<0.000000e+00> : vector<1x8xf32>
    %86 = tpu.matmul %85, %72, %cst_37 {dimension_numbers = #tpu.dot_dimension_numbers<[1], [1], [0], [0], [0, 0, 1, 0], [], []>} : vector<1x4xf32>, vector<8x4xf32>, vector<1x8xf32> -> vector<1x8xf32>
    %87 = arith.mulf %86, %86 : vector<1x8xf32>
    %88 = vector.shape_cast %87 : vector<1x8xf32> to vector<1x1x8xf32>
    %cst_38 = arith.constant dense<0.000000e+00> : vector<1xf32>
    %89 = vector.multi_reduction <add>, %88, %cst_38 [1, 2] : vector<1x1x8xf32> to vector<1xf32>
    %90 = vector.shape_cast %89 : vector<1xf32> to vector<1x1x1xf32>
    %91 = vector.extract %90[0, 0, 0] : f32 from vector<1x1x1xf32>
    %92 = vector.broadcast %91 : f32 to vector<1x1xf32>
    %93 = math.sqrt %92 : vector<1x1xf32>
    %cst_39 = arith.constant 9.99999996E-13 : f32
    %94 = vector.broadcast %cst_39 : f32 to vector<1x1xf32>
    %95 = arith.maximumf %93, %94 : vector<1x1xf32>
    %96 = vector.broadcast %95 : vector<1x1xf32> to vector<1x8xf32>
    %97 = arith.divf %86, %96 : vector<1x8xf32>
    %98 = arith.mulf %86, %97 : vector<1x8xf32>
    %99 = vector.shape_cast %98 : vector<1x8xf32> to vector<1x1x8xf32>
    %cst_40 = arith.constant dense<0.000000e+00> : vector<1xf32>
    %100 = vector.multi_reduction <add>, %99, %cst_40 [1, 2] : vector<1x1x8xf32> to vector<1xf32>
    %101 = vector.shape_cast %100 : vector<1xf32> to vector<1x1x1xf32>
    %102 = vector.extract %101[0, 0, 0] : f32 from vector<1x1x1xf32>
    %103 = vector.broadcast %102 : f32 to vector<1x1xf32>
    %cst_41 = arith.constant 1.000000e+00 : f32
    %104 = vector.broadcast %cst_41 : f32 to vector<1x1xf32>
    %105 = arith.divf %104, %103 : vector<1x1xf32>
    %c0_42 = arith.constant 0 : index
    %c0_43 = arith.constant 0 : index
    %106 = vector.load %arg8[%c0_42, %c0_43] : memref<1x1xf32, #tpu.memory_space<vmem>>, vector<1x1xf32>
    tpu.vector_store %arg8[%c0_42, %c0_43], %105 {strides = array<i32>} : memref<1x1xf32, #tpu.memory_space<vmem>>, vector<1x1xf32>,
    %c0_44 = arith.constant 0 : index
    %c0_45 = arith.constant 0 : index
    %107 = vector.load %arg11[%c0_44, %c0_45] : memref<1x8xf32, #tpu.memory_space<vmem>>, vector<1x8xf32>
    tpu.vector_store %arg11[%c0_44, %c0_45], %97 {strides = array<i32>} : memref<1x8xf32, #tpu.memory_space<vmem>>, vector<1x8xf32>,
    return
  }
}

</mosaic_0001>

<bundles_post_ra>
// kernel: tpu_custom_call.1
= control target key start
LH: loop header
LB: loop body
LE: loop exit
PB: predicated region body
PF: predicated region fallthrough
CT: control target
= control target key end

     0   :  { %17 = vsyncpa [#allocation3], 0  ;;  %s1211_s0 = inlined_call_operand.vmem [shape: f32[8,36], index: 0, kind: input, shape index: {}]   ;;  %s1212_s1 = inlined_call_operand.vmem [shape: f32[1,8], index: 1, kind: input, shape index: {}]   ;;  %s1213_s2 = inlined_call_operand.vmem [shape: f32[8,72], index: 2, kind: input, shape index: {}]   ;;  %s1214_s3 = inlined_call_operand.vmem [shape: f32[1,8], index: 3, kind: input, shape index: {}]   ;;  %s1215_s4 = inlined_call_operand.vmem [shape: f32[8,4], index: 4, kind: input, shape index: {}]   ;;  %s1216_s5 = inlined_call_operand.vmem [shape: f32[1,8], index: 5, kind: input, shape index: {}]   ;;  %s1217_s6 = inlined_call_operand.hbm [shape: f32[1,1], index: 6, kind: output, shape index: {0}]   ;;  %s1218_s7 = inlined_call_operand.hbm [shape: f32[1,1], index: 7, kind: output, shape index: {1}]   ;;  %s1219_s8 = inlined_call_operand.hbm [shape: f32[1,1], index: 8, kind: output, shape index: {2}]   ;;  %s1220_s9 = inlined_call_operand.hbm [shape: f32[1,8], index: 9, kind: output, shape index: {3}]   ;;  %s1221_s10 = inlined_call_operand.hbm [shape: f32[1,8], index: 10, kind: output, shape index: {4}]   ;;  %s1222_s11 = inlined_call_operand.hbm [shape: f32[1,8], index: 11, kind: output, shape index: {5}]  }
   0x1   :  { %18 = vsyncpa [#allocation5], 0 }
   0x2   :  { %19 = vsyncpa [#allocation8], 0  ;;  %v33_v0 = vld [vmem:[%s1211_s0] sm:$0xff]  ;;  %vm35_vm0 = vcmask 64512   ;;  %v1004_v2 = vmov 0.0   ;;  %vm1005_vm1 = vmmov 0  }
   0x3   :  { %v34_v1 = vld [vmem:[%s1212_s1] sm:$0x1]  ;;  %778 = vmatprep.subr.mxu0 %v1004_v2  ;;  %780 = vmatprep.mubr.msk.f32.mxu0 %vm1005_vm1, %v1004_v2 }
   0x4   :  { %20 = vsyncpa [#allocation11], 0  ;;  %779 = vmatpush3.msra.mxu0 %v33_v0  ;;  %783 = vmatprep.subr.mxu1 %v1004_v2  ;;  %vm110_vm2 = vcmask 286720   ;;  %vm132_vm3 = vcmask 293888   ;;  %v249_v23 = vld [vmem:[%s1213_s2] sm:$0xff]  ;;  %vm210_vm6 = vcmask 57344  }
   0x5   :  { %781 = vmatmul.mubr.msk.f32.vlgmr.msra.gmra.mrb[0].mxu0 %vm35_vm0, %v34_v1  ;;  %785 = vmatprep.mubr.msk.f32.mxu1 %vm1005_vm1, %v1004_v2  ;;  %v250_v24 = vld [vmem:[%s1214_s3] sm:$0x1]  ;;  %vm325_vm9 = vcmask 581632   ;;  %vm347_vm10 = vcmask 588800   ;;  %vm246_vm11 = vcmask 0   ;;  %vm538_vm14 = vcmask 24576  }
   0x6   :  { %788 = vmatprep.subr.mxu0 %v1004_v2  ;;  %790 = vmatprep.mubr.msk.f32.mxu0 %vm1005_vm1, %v1004_v2  ;;  %s1006_s12 = smov [#allocation4]  }
   0x7   :  { %784 = vmatpush3.xpose.msk.msra.mxu1 %vm132_vm3, %v33_v0  ;;  %789 = vmatpush3.msra.mxu0 %v249_v23  ;;  %s691_s13 = sshll.u32 %s1006_s12, 4  ;;  %s692_s13 = int_to_ptr.vmem [resolvable:$true] %s691_s13 }
   0x8   :  { %793 = vmatprep.subr.mxu1 %v1004_v2  ;;  %798 = vmatprep.subr.mxu0 %v1004_v2  ;;  %s864_s14 = scalar_lea.vmem %s692_s13, 16  ;;  %s868_s15 = scalar_lea.vmem %s692_s13, 32 }
   0x9   :  { %791 = vmatmul.mubr.msk.f32.vlgmr.msra.gmra.mrb[2].mxu0 %vm35_vm0, %v250_v24  ;;  %p865_p0 = scmp.ne.s32.totalorder %s692_s13, %s864_s14  ;;  %p869_p1 = scmp.lt.s32.totalorder %s692_s13, %s692_s13 }
   0xa   :  { %800 = vmatprep.mubr.msk.f32.mxu0 %vm1005_vm1, %v1004_v2  ;;  %p870_p2 = scmp.lt.s32.totalorder %s868_s15, %s864_s14 }
   0xc   :  { %p871_p3 = por %p870_p2, %p869_p1 }
   0xe   :  { %p872_p4 = pnand %p871_p3, %p865_p0 }
  0xd8   :  { %v105_v3 = vpop.f32.mrb[0].mxu0 }
  0xd9   :  { %v782_v4 = vpop.f32.mrb[1].mxu0  ;;  %v109_v5 = vmul.f32 %v105_v3, %v105_v3 }
  0xdb   :  { %v111_v6 = vsel %vm110_vm2, %v109_v5, 0.0 }
  0xdc   :  { %112 = vadd.xlane.f32.xlu0 %v111_v6  ;;  %v1104_v29 = vpop.f32.mrb[2].mxu0 }
  0xdd   :  { %v792_v30 = vpop.f32.mrb[3].mxu0  ;;  %v324_v47 = vmul.f32 %v1104_v29, %v1104_v29 }
  0xdf   :  { %v326_v50 = vsel %vm325_vm9, %v324_v47, 0.0 }
 0x169   :  { %v113_v7 = vpop.xlane.xlu0 %112 }
 0x16a   :  { %v114_v8 = vrot.slane %v113_v7, 4 }
 0x16c   :  { %v115_v9 = vadd.f32 %v114_v8, %v113_v7 }
 0x16e   :  { %v116_v10 = vrot.slane %v115_v9, 2 }
 0x170   :  { %v117_v11 = vadd.f32 %v116_v10, %v115_v9 }
 0x172   :  { %v118_v12 = vrot.slane %v117_v11, 1 }
 0x174   :  { %v119_v13 = vadd.f32 %v118_v12, %v117_v11 }
 0x176   :  { %808 = vpush %v119_v13  ;;  %v462_v13 = vld [vmem:[%s1215_s4] sm:$0xff] }
 0x177   :  { %799 = vmatpush3.msra.mxu0 %v462_v13 }
 0x1a7   :  { %s809_s0 = spop %808 }
 0x1a8   :  { %v121_v14 = vstv %s809_s0 }
 0x1a9   :  { %834 = vrsqrt.f32 %v121_v14  ;;  %vm124_vm4 = vcmp.eq.f32.partialorder %v121_v14, inf  ;;  %v127_v17 = vand.u32 2147483648, %v121_v14  ;;  %vm126_vm5 = vcmp.eq.f32.partialorder %v121_v14, 0.0 }
 0x1b3   :  { %v835_v15 = vpop.eup %834 }
 0x1b4   :  { %v123_v16 = vmul.f32 %v835_v15, %v121_v14 }
 0x1b6   :  { %v125_v18 = vsel %vm124_vm4, %v121_v14, %v123_v16  ;;  %v463_v14 = vld [vmem:[%s1216_s5] sm:$0x1] }
 0x1b7   :  { %v128_v19 = vsel %vm126_vm5, %v127_v17, %v125_v18  ;;  %801 = vmatmul.mubr.msk.f32.vlgmr.msra.gmra.mrb[4].mxu0 %vm35_vm0, %v463_v14 }
 0x1b8   :  { %v129_v20 = vmax.f32 %v128_v19, 1e-12 }
 0x1ba   :  { %836 = vrcp.f32 %v129_v20 }
 0x1c4   :  { %v837_v21 = vpop.eup %836 }
 0x1c5   :  { %v131_v22 = vmul.f32 %v837_v21, %v105_v3 }
 0x1c7   :  { %786 = vmatmul.mubr.msk.f32.vlgmr.msra.gmra.mrb[0].mxu1 %vm132_vm3, %v131_v22 }
 0x1c8   :  { %795 = vmatprep.mubr.msk.f32.mxu1 %vm1005_vm1, %v1004_v2  ;;  %794 = vmatpush3.xpose.msk.msra.mxu1 %vm347_vm10, %v249_v23 }
 0x1c9   :  { %803 = vmatprep.subr.mxu1 %v1004_v2 }
 0x28a   :  { %v1125_v19 = vpop.f32.mrb[4].mxu0 }
 0x28b   :  { %v802_v20 = vpop.f32.mrb[5].mxu0 }
 0x29a   :  { %v205_v25 = vpop.f32.mrb[0].mxu1 }
 0x29b   :  { %v787_v26 = vpop.f32.mrb[1].mxu1  ;;  %v209_v27 = vmul.f32 %v205_v25, %v205_v25 }
 0x29d   :  { %v211_v28 = vsel %vm210_vm6, %v209_v27, 0.0 }
 0x29e   :  { %212 = vadd.xlane.f32.xlu0 %v211_v28 }
 0x32b   :  { %v213_v31 = vpop.xlane.xlu0 %212 }
 0x32c   :  { %v214_v32 = vrot.slane %v213_v31, 4 }
 0x32e   :  { %v215_v33 = vadd.f32 %v214_v32, %v213_v31 }
 0x330   :  { %v216_v34 = vrot.slane %v215_v33, 2 }
 0x332   :  { %v217_v35 = vadd.f32 %v216_v34, %v215_v33 }
 0x334   :  { %v218_v36 = vrot.slane %v217_v35, 1 }
 0x336   :  { %v219_v37 = vadd.f32 %v218_v36, %v217_v35 }
 0x338   :  { %810 = vpush %v219_v37 }
 0x369   :  { %s811_s2 = spop %810 }
 0x36a   :  { %v221_v38 = vstv %s811_s2 }
 0x36b   :  { %838 = vrsqrt.f32 %v221_v38  ;;  %vm224_vm7 = vcmp.eq.f32.partialorder %v221_v38, inf  ;;  %v227_v41 = vand.u32 2147483648, %v221_v38  ;;  %vm226_vm8 = vcmp.eq.f32.partialorder %v221_v38, 0.0 }
 0x375   :  { %v839_v39 = vpop.eup %838 }
 0x376   :  { %v223_v40 = vmul.f32 %v839_v39, %v221_v38 }
 0x378   :  { %v225_v42 = vsel %vm224_vm7, %v221_v38, %v223_v40 }
 0x379   :  { %v228_v43 = vsel %vm226_vm8, %v227_v41, %v225_v42 }
 0x37a   :  { %v229_v44 = vmax.f32 %v228_v43, 1e-12 }
 0x37c   :  { %840 = vrcp.f32 %v229_v44 }
 0x386   :  { %v841_v45 = vpop.eup %840 }
 0x387   :  { %v231_v46 = vmul.f32 %v841_v45, %v205_v25 }
 0x389   :  { %v232_v48 = vmul.f32 %v231_v46, %v205_v25  ;;  %248 = vst.msk [vmem:[#allocation7] sm:$0x1] %vm210_vm6, %v231_v46 }
 0x38b   :  { %v233_v49 = vsel %vm210_vm6, %v232_v48, 0.0 }
 0x38c   :  { %234 = vadd.xlane.f32.xlu1 %v233_v49 }
 0x390   :  { %327 = vadd.xlane.f32.xlu1 %v326_v50 }
 0x419   :  { %v235_v51 = vpop.xlane.xlu1 %234 }
 0x41a   :  { %v236_v52 = vrot.slane %v235_v51, 4 }
 0x41c   :  { %v237_v53 = vadd.f32 %v236_v52, %v235_v51 }
 0x41d   :  { %v328_v54 = vpop.xlane.xlu1 %327 }
 0x41e   :  { %v238_v55 = vrot.slane %v237_v53, 2  ;;  %v329_v56 = vrot.slane %v328_v54, 4 }
 0x420   :  { %v330_v57 = vadd.f32 %v329_v56, %v328_v54  ;;  %v239_v58 = vadd.f32 %v238_v55, %v237_v53 }
 0x422   :  { %v331_v59 = vrot.slane %v330_v57, 2  ;;  %v240_v60 = vrot.slane %v239_v58, 1 }
 0x424   :  { %v241_v61 = vadd.f32 %v240_v60, %v239_v58  ;;  %v332_v62 = vadd.f32 %v331_v59, %v330_v57 }
 0x426   :  { %812 = vpush %v241_v61  ;;  %v333_v63 = vrot.slane %v332_v62, 1 }
 0x428   :  { %v334_v0 = vadd.f32 %v333_v63, %v332_v62 }
 0x42a   :  { %814 = vpush %v334_v0 }
 0x457   :  { %s813_s3 = spop %812 }
 0x458   :  { %v243_v1 = vstv %s813_s3 }
 0x459   :  { %842 = vrcp.f32 %v243_v1 }
 0x45b   :  { %s815_s24 = spop %814 }
 0x45c   :  { %v336_v3 = vstv %s815_s24 }
 0x45d   :  { %844 = vrsqrt.f32 %v336_v3  ;;  %vm339_vm12 = vcmp.eq.f32.partialorder %v336_v3, inf  ;;  %v342_v7 = vand.u32 2147483648, %v336_v3  ;;  %vm341_vm13 = vcmp.eq.f32.partialorder %v336_v3, 0.0 }
 0x463   :  { %v843_v4 = vpop.eup %842 }
 0x464   :  { %247 = vst.msk [vmem:[#allocation2] sm:$0x1] %vm246_vm11, %v843_v4 }
 0x467   :  { %v845_v5 = vpop.eup %844 }
 0x468   :  { %v338_v6 = vmul.f32 %v845_v5, %v336_v3 }
 0x46a   :  { %v340_v8 = vsel %vm339_vm12, %v336_v3, %v338_v6 }
 0x46b   :  { %v343_v9 = vsel %vm341_vm13, %v342_v7, %v340_v8 }
 0x46c   :  { %v344_v10 = vmax.f32 %v343_v9, 1e-12 }
 0x46e   :  { %846 = vrcp.f32 %v344_v10 }
 0x478   :  { %v847_v11 = vpop.eup %846 }
 0x479   :  { %v346_v12 = vmul.f32 %v847_v11, %v1104_v29 }
 0x47b   :  { %796 = vmatmul.mubr.msk.f32.vlgmr.msra.gmra.mrb[2].mxu1 %vm347_vm10, %v346_v12 }
 0x47c   :  { %805 = vmatprep.mubr.msk.f32.mxu1 %vm1005_vm1, %v1004_v2  ;;  %v537_v2 = vmul.f32 %v1125_v19, %v1125_v19  ;;  %vm560_vm1 = vcmask 31744  }
 0x47d   :  { %804 = vmatpush3.xpose.msk.msra.mxu1 %vm560_vm1, %v462_v13 }
 0x47e   :  { %v539_v21 = vsel %vm538_vm14, %v537_v2, 0.0 }
 0x54e   :  { %v420_v15 = vpop.f32.mrb[2].mxu1 }
 0x54f   :  { %v797_v16 = vpop.f32.mrb[3].mxu1  ;;  %v424_v17 = vmul.f32 %v420_v15, %v420_v15 }
 0x551   :  { %v425_v18 = vsel %vm210_vm6, %v424_v17, 0.0 }
 0x552   :  { %426 = vadd.xlane.f32.xlu0 %v425_v18 }
 0x556   :  { %540 = vadd.xlane.f32.xlu0 %v539_v21 }
 0x5df   :  { %v427_v22 = vpop.xlane.xlu0 %426 }
 0x5e0   :  { %v428_v23 = vrot.slane %v427_v22, 4 }
 0x5e2   :  { %v429_v24 = vadd.f32 %v428_v23, %v427_v22 }
 0x5e3   :  { %v541_v40 = vpop.xlane.xlu0 %540 }
 0x5e4   :  { %v430_v25 = vrot.slane %v429_v24, 2  ;;  %v542_v41 = vrot.slane %v541_v40, 4 }
 0x5e6   :  { %v431_v26 = vadd.f32 %v430_v25, %v429_v24  ;;  %v543_v42 = vadd.f32 %v542_v41, %v541_v40 }
 0x5e8   :  { %v432_v27 = vrot.slane %v431_v26, 1  ;;  %v544_v43 = vrot.slane %v543_v42, 2 }
 0x5ea   :  { %v433_v28 = vadd.f32 %v432_v27, %v431_v26  ;;  %v545_v47 = vadd.f32 %v544_v43, %v543_v42 }
 0x5ec   :  { %816 = vpush %v433_v28  ;;  %v546_v50 = vrot.slane %v545_v47, 1 }
 0x5ee   :  { %v547_v53 = vadd.f32 %v546_v50, %v545_v47 }
 0x61d   :  { %s817_s4 = spop %816 }
 0x61e   :  { %v435_v29 = vstv %s817_s4 }
 0x61f   :  { %848 = vrsqrt.f32 %v435_v29  ;;  %vm438_vm15 = vcmp.eq.f32.partialorder %v435_v29, inf  ;;  %v441_v32 = vand.u32 2147483648, %v435_v29  ;;  %vm440_vm0 = vcmp.eq.f32.partialorder %v435_v29, 0.0 }
 0x629   :  { %v849_v30 = vpop.eup %848 }
 0x62a   :  { %v437_v31 = vmul.f32 %v849_v30, %v435_v29 }
 0x62c   :  { %v439_v33 = vsel %vm438_vm15, %v435_v29, %v437_v31 }
 0x62d   :  { %v442_v34 = vsel %vm440_vm0, %v441_v32, %v439_v33 }
 0x62e   :  { %v443_v35 = vmax.f32 %v442_v34, 1e-12 }
 0x630   :  { %850 = vrcp.f32 %v443_v35 }
 0x63a   :  { %v851_v36 = vpop.eup %850 }
 0x63b   :  { %v445_v37 = vmul.f32 %v851_v36, %v420_v15 }
 0x63d   :  { %v446_v38 = vmul.f32 %v445_v37, %v420_v15  ;;  %461 = vst.msk [vmem:[#allocation9] sm:$0x1] %vm210_vm6, %v445_v37 }
 0x63f   :  { %v447_v39 = vsel %vm210_vm6, %v446_v38, 0.0 }
 0x640   :  { %448 = vadd.xlane.f32.xlu1 %v447_v39 }
 0x6cd   :  { %v449_v44 = vpop.xlane.xlu1 %448 }
 0x6ce   :  { %v450_v45 = vrot.slane %v449_v44, 4 }
 0x6d0   :  { %v451_v46 = vadd.f32 %v450_v45, %v449_v44 }
 0x6d2   :  { %v452_v48 = vrot.slane %v451_v46, 2 }
 0x6d4   :  { %v453_v49 = vadd.f32 %v452_v48, %v451_v46 }
 0x6d6   :  { %v454_v51 = vrot.slane %v453_v49, 1 }
 0x6d8   :  { %v455_v52 = vadd.f32 %v454_v51, %v453_v49 }
 0x6da   :  { %818 = vpush %v455_v52 }
 0x6db   :  { %820 = vpush %v547_v53 }
 0x70b   :  { %s819_s5 = spop %818 }
 0x70c   :  { %v457_v54 = vstv %s819_s5  ;;  %s821_s29 = spop %820 }
 0x70d   :  { %852 = vrcp.f32 %v457_v54  ;;  %v549_v55 = vstv %s821_s29 }
 0x70e   :  { %854 = vrsqrt.f32 %v549_v55  ;;  %vm552_vm2 = vcmp.eq.f32.partialorder %v549_v55, inf  ;;  %v555_v59 = vand.u32 2147483648, %v549_v55  ;;  %vm554_vm3 = vcmp.eq.f32.partialorder %v549_v55, 0.0 }
 0x717   :  { %v853_v56 = vpop.eup %852 }
 0x718   :  { %v855_v57 = vpop.eup %854  ;;  %460 = vst.msk [vmem:[#allocation4] sm:$0x1] %vm246_vm11, %v853_v56 }
 0x719   :  { %v551_v58 = vmul.f32 %v855_v57, %v549_v55 }
 0x71b   :  { %v553_v60 = vsel %vm552_vm2, %v549_v55, %v551_v58 }
 0x71c   :  { %v556_v61 = vsel %vm554_vm3, %v555_v59, %v553_v60 }
 0x71d   :  { %v557_v62 = vmax.f32 %v556_v61, 1e-12 }
 0x71f   :  { %856 = vrcp.f32 %v557_v62 }
 0x729   :  { %v857_v63 = vpop.eup %856 }
 0x72a   :  { %v559_v0 = vmul.f32 %v857_v63, %v1125_v19 }
 0x72c   :  { %806 = vmatmul.mubr.msk.f32.vlgmr.msra.gmra.mrb[4].mxu1 %vm560_vm1, %v559_v0 }
 0x7ff   :  { %v633_v1 = vpop.f32.mrb[4].mxu1 }
 0x800   :  { %v807_v3 = vpop.f32.mrb[5].mxu1  ;;  %v637_v4 = vmul.f32 %v633_v1, %v633_v1 }
 0x802   :  { %v638_v5 = vsel %vm210_vm6, %v637_v4, 0.0 }
 0x803   :  { %639 = vadd.xlane.f32.xlu1 %v638_v5 }
 0x890   :  { %v640_v6 = vpop.xlane.xlu1 %639 }
 0x891   :  { %v641_v7 = vrot.slane %v640_v6, 4 }
 0x893   :  { %v642_v8 = vadd.f32 %v641_v7, %v640_v6 }
 0x895   :  { %v643_v9 = vrot.slane %v642_v8, 2 }
 0x897   :  { %v644_v10 = vadd.f32 %v643_v9, %v642_v8 }
 0x899   :  { %v645_v11 = vrot.slane %v644_v10, 1 }
 0x89b   :  { %v646_v12 = vadd.f32 %v645_v11, %v644_v10 }
 0x89d   :  { %822 = vpush %v646_v12 }
 0x8ce   :  { %s823_s30 = spop %822 }
 0x8cf   :  { %v648_v13 = vstv %s823_s30 }
 0x8d0   :  { %858 = vrsqrt.f32 %v648_v13  ;;  %vm651_vm4 = vcmp.eq.f32.partialorder %v648_v13, inf  ;;  %v654_v16 = vand.u32 2147483648, %v648_v13  ;;  %vm653_vm5 = vcmp.eq.f32.partialorder %v648_v13, 0.0 }
 0x8da   :  { %v859_v14 = vpop.eup %858 }
 0x8db   :  { %v650_v15 = vmul.f32 %v859_v14, %v648_v13 }
 0x8dd   :  { %v652_v17 = vsel %vm651_vm4, %v648_v13, %v650_v15 }
 0x8de   :  { %v655_v18 = vsel %vm653_vm5, %v654_v16, %v652_v17 }
 0x8df   :  { %v656_v19 = vmax.f32 %v655_v18, 1e-12 }
 0x8e1   :  { %860 = vrcp.f32 %v656_v19 }
 0x8eb   :  { %v861_v2 = vpop.eup %860 }
 0x8ec   :  { %v658_v20 = vmul.f32 %v861_v2, %v633_v1 }
 0x8ee   :  { %v659_v21 = vmul.f32 %v658_v20, %v633_v1  ;;  %674 = vst.msk [vmem:[#allocation10] sm:$0x1] %vm210_vm6, %v658_v20 }
 0x8f0   :  { %v660_v22 = vsel %vm210_vm6, %v659_v21, 0.0 }
 0x8f1   :  { %661 = vadd.xlane.f32.xlu0 %v660_v22 }
 0x8f2   :  { %875 = shalt.err (!%p872_p4)
}
 0x8f3   :  { %s876_s18 = scalar_lea.hbm %s1218_s7, 16 }
 0x8f4   :  { %p877_p5 = scmp.ne.s32.totalorder %s1218_s7, %s876_s18  ;;  %p880_p6 = scmp.lt.u32.totalorder %s876_s18, %s1218_s7 }
 0x8f6   :  { %p882_p7 = pnand %p880_p6, %p877_p5 }
 0x8f8   :  { %885 = shalt.err (!%p882_p7)
}
 0x8f9   :  { %694 = dma.vmem_to_hbm [thread:$0]  %s692_s13, 16, %s1218_s7, [#allocation5]  }
 0x8fa   :  { %s1007_s23 = smov [#allocation7]   ;;  %s1008_s3 = smov [#allocation2]  }
 0x8fb   :  { %s711_s2 = sshll.u32 %s1007_s23, 4  ;;  %s681_s24 = sshll.u32 %s1008_s3, 4  ;;  %s712_s2 = int_to_ptr.vmem [resolvable:$true] %s711_s2  ;;  %s682_s24 = int_to_ptr.vmem [resolvable:$true] %s681_s24 }
 0x8fc   :  { %s886_s25 = scalar_lea.vmem %s712_s2, 16  ;;  %s890_s26 = scalar_lea.vmem %s712_s2, 32 }
 0x8fd   :  { %p887_p8 = scmp.ne.s32.totalorder %s712_s2, %s886_s25  ;;  %p891_p9 = scmp.lt.s32.totalorder %s712_s2, %s712_s2 }
 0x8fe   :  { %p892_p10 = scmp.lt.s32.totalorder %s890_s26, %s886_s25 }
 0x900   :  { %p893_p11 = por %p892_p10, %p891_p9 }
 0x902   :  { %p894_p12 = pnand %p893_p11, %p887_p8 }
 0x904   :  { %897 = shalt.err (!%p894_p12)
}
 0x905   :  { %s898_s4 = scalar_lea.hbm %s1220_s9, 16 }
 0x906   :  { %p899_p13 = scmp.ne.s32.totalorder %s1220_s9, %s898_s4  ;;  %p902_p0 = scmp.lt.u32.totalorder %s898_s4, %s1220_s9 }
 0x908   :  { %p904_p1 = pnand %p902_p0, %p899_p13 }
 0x90a   :  { %907 = shalt.err (!%p904_p1)
}
 0x90b   :  { %714 = dma.vmem_to_hbm [thread:$0]  %s712_s2, 16, %s1220_s9, [#allocation8]  }
 0x90c   :  { %s908_s14 = scalar_lea.vmem %s682_s24, 16  ;;  %s912_s15 = scalar_lea.vmem %s682_s24, 32 }
 0x90d   :  { %p909_p2 = scmp.ne.s32.totalorder %s682_s24, %s908_s14  ;;  %p913_p3 = scmp.lt.s32.totalorder %s682_s24, %s682_s24 }
 0x90e   :  { %p914_p4 = scmp.lt.s32.totalorder %s912_s15, %s908_s14 }
 0x910   :  { %p915_p5 = por %p914_p4, %p913_p3 }
 0x912   :  { %p916_p6 = pnand %p915_p5, %p909_p2 }
 0x914   :  { %919 = shalt.err (!%p916_p6)
}
 0x915   :  { %s920_s18 = scalar_lea.hbm %s1217_s6, 16 }
 0x916   :  { %p921_p7 = scmp.ne.s32.totalorder %s1217_s6, %s920_s18  ;;  %p924_p8 = scmp.lt.u32.totalorder %s920_s18, %s1217_s6 }
 0x918   :  { %p926_p9 = pnand %p924_p8, %p921_p7 }
 0x91a   :  { %929 = shalt.err (!%p926_p9)
}
 0x91b   :  { %684 = dma.vmem_to_hbm [thread:$0]  %s682_s24, 16, %s1217_s6, [#allocation3]  }
 0x91c   :  { %s1009_s22 = smov [#allocation9]  }
 0x91d   :  { %s721_s23 = sshll.u32 %s1009_s22, 4  ;;  %s722_s23 = int_to_ptr.vmem [resolvable:$true] %s721_s23 }
 0x91e   :  { %s930_s2 = scalar_lea.vmem %s722_s23, 16  ;;  %s934_s3 = scalar_lea.vmem %s722_s23, 32 }
 0x91f   :  { %p931_p10 = scmp.ne.s32.totalorder %s722_s23, %s930_s2  ;;  %p935_p11 = scmp.lt.s32.totalorder %s722_s23, %s722_s23 }
 0x920   :  { %p936_p12 = scmp.lt.s32.totalorder %s934_s3, %s930_s2 }
 0x922   :  { %p937_p13 = por %p936_p12, %p935_p11 }
 0x924   :  { %p938_p0 = pnand %p937_p13, %p931_p10 }
 0x926   :  { %941 = shalt.err (!%p938_p0)
}
 0x927   :  { %s942_s27 = scalar_lea.hbm %s1221_s10, 16 }
 0x928   :  { %p943_p1 = scmp.ne.s32.totalorder %s1221_s10, %s942_s27  ;;  %p946_p2 = scmp.lt.u32.totalorder %s942_s27, %s1221_s10 }
 0x92a   :  { %p948_p3 = pnand %p946_p2, %p943_p1 }
 0x92c   :  { %951 = shalt.err (!%p948_p3)
}
 0x92d   :  { %724 = dma.vmem_to_hbm [thread:$0]  %s722_s23, 16, %s1221_s10, [#allocation8]  }
 0x92e   :  { %s1010_s7 = smov [#allocation10]  }
 0x92f   :  { %s731_s30 = sshll.u32 %s1010_s7, 4  ;;  %s732_s30 = int_to_ptr.vmem [resolvable:$true] %s731_s30 }
 0x930   :  { %s952_s12 = scalar_lea.vmem %s732_s30, 16  ;;  %s956_s13 = scalar_lea.vmem %s732_s30, 32 }
 0x931   :  { %p953_p4 = scmp.ne.s32.totalorder %s732_s30, %s952_s12  ;;  %p957_p5 = scmp.lt.s32.totalorder %s732_s30, %s732_s30 }
 0x932   :  { %p958_p6 = scmp.lt.s32.totalorder %s956_s13, %s952_s12 }
 0x934   :  { %p959_p7 = por %p958_p6, %p957_p5 }
 0x936   :  { %p960_p8 = pnand %p959_p7, %p953_p4 }
 0x938   :  { %963 = shalt.err (!%p960_p8)
}
 0x939   :  { %s964_s16 = scalar_lea.hbm %s1222_s11, 16 }
 0x93a   :  { %p965_p9 = scmp.ne.s32.totalorder %s1222_s11, %s964_s16  ;;  %p968_p10 = scmp.lt.u32.totalorder %s964_s16, %s1222_s11 }
 0x93c   :  { %p970_p11 = pnand %p968_p10, %p965_p9 }
 0x93e   :  { %973 = shalt.err (!%p970_p11)
}
 0x93f   :  { %734 = dma.vmem_to_hbm [thread:$0]  %s732_s30, 16, %s1222_s11, [#allocation11]  }
 0x940   :  { %s1011_s9 = smov [#allocation6]  }
 0x941   :  { %s701_s21 = sshll.u32 %s1011_s9, 4  ;;  %s702_s21 = int_to_ptr.vmem [resolvable:$true] %s701_s21 }
 0x942   :  { %s974_s22 = scalar_lea.vmem %s702_s21, 16  ;;  %s978_s11 = scalar_lea.vmem %s702_s21, 32 }
 0x943   :  { %p975_p12 = scmp.ne.s32.totalorder %s702_s21, %s974_s22  ;;  %p979_p13 = scmp.lt.s32.totalorder %s702_s21, %s702_s21 }
 0x944   :  { %p980_p0 = scmp.lt.s32.totalorder %s978_s11, %s974_s22 }
 0x946   :  { %p981_p1 = por %p980_p0, %p979_p13 }
 0x948   :  { %p982_p2 = pnand %p981_p1, %p975_p12 }
 0x97e   :  { %v662_v23 = vpop.xlane.xlu0 %661 }
 0x97f   :  { %v663_v24 = vrot.slane %v662_v23, 4 }
 0x981   :  { %v664_v25 = vadd.f32 %v663_v24, %v662_v23 }
 0x983   :  { %v665_v26 = vrot.slane %v664_v25, 2 }
 0x985   :  { %v666_v27 = vadd.f32 %v665_v26, %v664_v25 }
 0x987   :  { %v667_v28 = vrot.slane %v666_v27, 1 }
 0x989   :  { %v668_v29 = vadd.f32 %v667_v28, %v666_v27 }
 0x98b   :  { %824 = vpush %v668_v29 }
 0x9bc   :  { %s825_s1 = spop %824 }
 0x9bd   :  { %v670_v30 = vstv %s825_s1 }
 0x9be   :  { %862 = vrcp.f32 %v670_v30 }
 0x9c8   :  { %v863_v31 = vpop.eup %862 }
 0x9c9   :  { %673 = vst.msk [vmem:[#allocation6] sm:$0x1] %vm246_vm11, %v863_v31 }
 0x9ca   :  { %985 = shalt.err (!%p982_p2)
}
 0x9cb   :  { %s986_s3 = scalar_lea.hbm %s1219_s8, 16 }
 0x9cc   :  { %p987_p3 = scmp.ne.s32.totalorder %s1219_s8, %s986_s3  ;;  %p990_p4 = scmp.lt.u32.totalorder %s986_s3, %s1219_s8 }
 0x9ce   :  { %p992_p5 = pnand %p990_p4, %p987_p3 }
 0x9d0   :  { %995 = shalt.err (!%p992_p5)
}
 0x9d1   :  { %704 = dma.vmem_to_hbm [thread:$0]  %s702_s21, 16, %s1219_s8, [#allocation5]  }
 0x9d2   :  { %996 = dma.done.wait [#allocation3], 16  }
 0x9d3   :  { %997 = vsyncadd [#allocation3], 4294967280 }
 0x9d4   :  { %998 = dma.done.wait [#allocation5], 32  }
 0x9d5   :  { %999 = vsyncadd [#allocation5], 4294967264 }
 0x9d6   :  { %1000 = dma.done.wait [#allocation8], 32  }
 0x9d7   :  { %1001 = vsyncadd [#allocation8], 4294967264 }
 0x9d8   :  { %1002 = dma.done.wait [#allocation11], 16  }
 0x9d9   :  { %1003 = vsyncadd [#allocation11], 4294967280 }
 0x9da   :  { %753 = vsyncpa [#allocation3], 1 }
 0x9db   :  { %754 = vsyncpa [#allocation5], 1 }
 0x9dc   :  { %755 = vsyncpa [#allocation8], 1 }
 0x9dd   :  { %756 = vsyncpa [#allocation11], 1 }

</bundles_post_ra>
